<compile_context>
chip_gen: v7x
topology: tpu7x:2x2x1
jax: 0.10.0
libtpu: 0.0.40
codegen_flags: <defaults>
</compile_context>

<pallas_src>
import math

import jax
import jax.numpy as jnp
from jax.experimental import pallas as pl
from jax.experimental.pallas import tpu as pltpu

# ---------------- hyperparameters (BesoPolicy __init__ args, synthetic) ------
SIGMA_DATA = 0.5
SIGMA_MIN = 0.1
SIGMA_MAX = 1.0
RHO = 7.0
N_SAMPLING_STEPS = 4          # sampler_type='euler', noise_scheduler='karras'
MIN_ACTION, MAX_ACTION = -1.0, 1.0

OBS_DIM = 16                  # raw state dim
EMB_DIM = 32                  # obs_encoder output dim
HID_DIM = 32                  # denoiser hidden dim
ACT_DIM = 8                   # action dim
BATCH = 2

# ---------------- padded layout (lane-dense 128, sublane-8) -------------------
F_PAD = 128
SUB = 8
B_PAD = max(SUB, ((BATCH + SUB - 1) // SUB) * SUB)

# lane windows inside the single shared 128x128 weight block
X_LO = 0            # x / action
S_LO = 8            # raw state
H_LO = 24           # encoder hidden
O_LO = 56           # obs embedding
D_LO = 88           # denoiser hidden

# slab rows (f32, 144 x 128 = 72 KB)
W_OFF = 0                       # rows [0,128): shared weight block
B_TILE0_OFF = 128               # row 128: enc_b1 | 129: enc_b2 | 130..133: per-step den L1 bias
B_TILE1_OFF = 136               # rows 136..139: per-step x-update bias (b_i * den_b2)
P_ROWS = 144


# ---------------- trace-time (Python) noise schedule & preconditioning -------
def _karras_sigmas():
    ramp = [i / (N_SAMPLING_STEPS - 1) for i in range(N_SAMPLING_STEPS)]
    lo = SIGMA_MIN ** (1.0 / RHO)
    hi = SIGMA_MAX ** (1.0 / RHO)
    sig = [(hi + r * (lo - hi)) ** RHO for r in ramp]
    return sig + [0.0]                         # appended 0 only used as dt endpoint


_SIGMAS = _karras_sigmas()


def _step_consts(i):
    """Karras preconditioning scalars for step i, as Python float literals."""
    s = _SIGMAS[i]
    sd2 = SIGMA_DATA * SIGMA_DATA
    denom = s * s + sd2
    c_skip = sd2 / denom
    c_out = s * SIGMA_DATA / math.sqrt(denom)
    c_in = 1.0 / math.sqrt(denom)
    c_noise = 0.25 * math.log(s)
    dt = _SIGMAS[i + 1] - s
    return c_skip, c_out, c_in, c_noise, dt, 1.0 / s


def _euler_affine(i):
    """Folded Euler update: x_{i+1} = a_i*x + b_i*(h1@W2) + b_i*b2."""
    c_skip, c_out, c_in, _c_noise, dt, inv_sigma = _step_consts(i)
    r = dt * inv_sigma
    a_i = 1.0 + r * (1.0 - c_skip)
    b_i = -r * c_out
    return a_i, b_i, c_in


# ---------------- fused Pallas kernel -----------------------------------------
def _beso_fused_kernel(state_ref, noise_ref, p_ref, out_ref):
    # Single shared 128x128 lane-window-packed weight block: the ONLY RHS used
    # by all 10 matmuls in the kernel.
    W = p_ref[W_OFF:W_OFF + F_PAD, :]                          # (128, 128)
    btile = p_ref[B_TILE0_OFF:B_TILE0_OFF + SUB, :]            # (8, 128) bias tile
    xbias = p_ref[B_TILE1_OFF:B_TILE1_OFF + SUB, :]            # (8, 128) per-step out bias

    enc_b1 = btile[0:1, :]
    enc_b2 = btile[1:2, :]

    # ---- obs encoder: state(8:24) -> hidden(24:56) -> obs(56:88) -----------
    h = jnp.maximum(
        jnp.dot(state_ref[...], W, preferred_element_type=jnp.float32) + enc_b1,
        0.0)
    obs = jnp.dot(h, W, preferred_element_type=jnp.float32) + enc_b2

    # ---- Euler sampling over the Karras schedule (fully unrolled, N=4) -----
    # x lives in lanes [0,8), obs in lanes [56,88): disjoint windows, so the
    # denoiser first layer (x-branch + obs-branch) is ONE matmul per step.
    x = noise_ref[...] * SIGMA_MAX
    for i in range(N_SAMPLING_STEPS):
        a_i, b_i, c_in = _euler_affine(i)
        act = obs + c_in * x
        h1 = jnp.maximum(
            jnp.dot(act, W, preferred_element_type=jnp.float32)
            + btile[2 + i:3 + i, :],
            0.0)
        f2 = jnp.dot(h1, W, preferred_element_type=jnp.float32)
        x = a_i * x + b_i * f2 + xbias[i:i + 1, :]

    out_ref[...] = jnp.clip(x, MIN_ACTION, MAX_ACTION)


# ---------------- wrappers ----------------------------------------------------
def pack_params(enc_params, den_params):
    """Pack all weights/biases into one shared lane-window (144, 128) f32 slab."""
    w1, b1, w2, b2 = enc_params
    wx, wo, wn, db1, dw2, db2 = den_params
    slab = jnp.zeros((P_ROWS, F_PAD), jnp.float32)
    # shared weight block: rows = input lane window, cols = output lane window
    slab = slab.at[S_LO:S_LO + OBS_DIM, H_LO:H_LO + EMB_DIM].set(w1)    # enc layer 1
    slab = slab.at[H_LO:H_LO + EMB_DIM, O_LO:O_LO + EMB_DIM].set(w2)    # enc layer 2
    slab = slab.at[X_LO:X_LO + ACT_DIM, D_LO:D_LO + HID_DIM].set(wx)    # den L1, x branch
    slab = slab.at[O_LO:O_LO + EMB_DIM, D_LO:D_LO + HID_DIM].set(wo)    # den L1, obs branch
    slab = slab.at[D_LO:D_LO + HID_DIM, X_LO:X_LO + ACT_DIM].set(dw2)   # den layer 2
    # encoder biases
    slab = slab.at[B_TILE0_OFF + 0, H_LO:H_LO + EMB_DIM].set(b1[0])
    slab = slab.at[B_TILE0_OFF + 1, O_LO:O_LO + EMB_DIM].set(b2[0])
    # per-step folded biases
    for i in range(N_SAMPLING_STEPS):
        _c_skip, _c_out, _c_in, c_noise, _dt, _inv = _step_consts(i)
        _a_i, b_i, _ = _euler_affine(i)
        slab = slab.at[B_TILE0_OFF + 2 + i, D_LO:D_LO + HID_DIM].set(
            db1[0] + c_noise * wn[0])
        slab = slab.at[B_TILE1_OFF + i, X_LO:X_LO + ACT_DIM].set(b_i * db2[0])
    return slab


def beso_forward(state, packed_params, noise_key):
    """BesoPolicy.forward (euler sampler, karras schedule, empty action_context)."""
    B = state.shape[0]
    noise = jax.random.normal(noise_key, (B, ACT_DIM), jnp.float32)

    # zero-pad into the lane windows; zeros in all foreign lanes keep the
    # shared-block packing exact.
    state_p = jnp.zeros((B_PAD, F_PAD), jnp.float32).at[:B, S_LO:S_LO + OBS_DIM].set(state)
    noise_p = jnp.zeros((B_PAD, F_PAD), jnp.float32).at[:B, X_LO:X_LO + ACT_DIM].set(noise)

    # NOTE(v7x): with a single tile only one TensorCore runs; if BATCH grows
    # (>=~256 padded rows), add a leading batch-tile grid axis marked "parallel".
    out_p = pl.pallas_call(
        _beso_fused_kernel,
        out_shape=jax.ShapeDtypeStruct((B_PAD, F_PAD), jnp.float32),
        in_specs=[
            pl.BlockSpec(memory_space=pltpu.MemorySpace.VMEM),
            pl.BlockSpec(memory_space=pltpu.MemorySpace.VMEM),
            pl.BlockSpec(memory_space=pltpu.MemorySpace.VMEM),
        ],
        out_specs=pl.BlockSpec(memory_space=pltpu.MemorySpace.VMEM),
        cost_estimate=pl.CostEstimate(
            flops=2 * 10 * B_PAD * F_PAD * F_PAD,
            transcendentals=0,
            bytes_accessed=(P_ROWS * F_PAD + 3 * B_PAD * F_PAD) * 4),
    )(state_p, noise_p, packed_params)

    x_0 = out_p[:B, X_LO:X_LO + ACT_DIM][:, None, :]                 # (B, 1, ACT_DIM)
    return x_0


# ---------------- deterministic parameter init --------------------------------
def init_params():
    ks = jax.random.split(jax.random.PRNGKey(0), 8)
    enc_params = (
        0.1 * jax.random.normal(ks[0], (OBS_DIM, EMB_DIM), jnp.float32),
        jnp.zeros((1, EMB_DIM), jnp.float32),
        0.1 * jax.random.normal(ks[1], (EMB_DIM, EMB_DIM), jnp.float32),
        jnp.zeros((1, EMB_DIM), jnp.float32),
    )
    den_params = (
        0.1 * jax.random.normal(ks[2], (ACT_DIM, HID_DIM), jnp.float32),   # wx
        0.1 * jax.random.normal(ks[3], (EMB_DIM, HID_DIM), jnp.float32),   # wo
        0.1 * jax.random.normal(ks[4], (1, HID_DIM), jnp.float32),         # wn
        jnp.zeros((1, HID_DIM), jnp.float32),                              # b1
        0.1 * jax.random.normal(ks[5], (HID_DIM, ACT_DIM), jnp.float32),   # w2
        jnp.zeros((1, ACT_DIM), jnp.float32),                              # b2
    )
    return enc_params, den_params


# ---------------- pure-JAX reference (plumbing check) --------------------------
def _reference_forward(state, enc_params, den_params, noise):
    w1, b1, w2, b2 = enc_params
    wx, wo, wn, db1, dw2, db2 = den_params
    obs = jnp.maximum(state @ w1 + b1, 0.0) @ w2 + b2
    x = noise * SIGMA_MAX
    for i in range(N_SAMPLING_STEPS):
        c_skip, c_out, c_in, c_noise, dt, inv_sigma = _step_consts(i)
        h1 = jnp.maximum((c_in * x) @ wx + obs @ wo + c_noise * wn + db1, 0.0)
        f = h1 @ dw2 + db2
        denoised = c_skip * x + c_out * f
        x = x + (x - denoised) * (inv_sigma * dt)
    return jnp.clip(x, MIN_ACTION, MAX_ACTION)[:, None, :]


if __name__ == "__main__":
    enc_params, den_params = init_params()
    packed = pack_params(enc_params, den_params)       # one-time parameter packing

    key = jax.random.PRNGKey(0)
    k_state, k_noise = jax.random.split(key)
    state = jax.random.normal(k_state, (BATCH, OBS_DIM), jnp.float32)

    fwd = jax.jit(beso_forward)
    x_0 = jax.block_until_ready(fwd(state, packed, k_noise))

    assert x_0.shape == (BATCH, 1, ACT_DIM)
    assert bool(jnp.all(jnp.isfinite(x_0)))
    assert bool(jnp.all(x_0 >= MIN_ACTION)) and bool(jnp.all(x_0 <= MAX_ACTION))

    # plumbing check vs. pure-JAX reference (same constants, same noise)
    noise = jax.random.normal(k_noise, (BATCH, ACT_DIM), jnp.float32)
    ref = _reference_forward(state, enc_params, den_params, noise)
    assert bool(jnp.allclose(x_0, ref, atol=5e-3, rtol=5e-3))

    print("KERNEL_OK")
</pallas_src>

<mosaic_0001>
module attributes {stable_mosaic.version = 11 : i64} {
  func.func @_beso_fused_kernel(%arg0: memref<8x128xf32, #tpu.memory_space<vmem>>, %arg1: memref<8x128xf32, #tpu.memory_space<vmem>>, %arg2: memref<144x128xf32, #tpu.memory_space<vmem>>, %arg3: memref<8x128xf32, #tpu.memory_space<vmem>>) attributes {dimension_semantics = [], scalar_prefetch = 0 : i64, scratch_operands = 0 : i64, tpu.core_type = #tpu.core_type<tc>} {
    %c0 = arith.constant 0 : index
    %c0_0 = arith.constant 0 : index
    %0 = vector.load %arg2[%c0, %c0_0] : memref<144x128xf32, #tpu.memory_space<vmem>>, vector<128x128xf32>
    %c128 = arith.constant 128 : index
    %c0_1 = arith.constant 0 : index
    %1 = vector.load %arg2[%c128, %c0_1] : memref<144x128xf32, #tpu.memory_space<vmem>>, vector<8x128xf32>
    %c136 = arith.constant 136 : index
    %c0_2 = arith.constant 0 : index
    %2 = vector.load %arg2[%c136, %c0_2] : memref<144x128xf32, #tpu.memory_space<vmem>>, vector<8x128xf32>
    %3 = vector.extract_strided_slice %1 {offsets = [0, 0], sizes = [1, 128], strides = [1, 1]} : vector<8x128xf32> to vector<1x128xf32>
    %4 = vector.extract_strided_slice %1 {offsets = [1, 0], sizes = [1, 128], strides = [1, 1]} : vector<8x128xf32> to vector<1x128xf32>
    %c0_3 = arith.constant 0 : index
    %c0_4 = arith.constant 0 : index
    %5 = vector.load %arg0[%c0_3, %c0_4] : memref<8x128xf32, #tpu.memory_space<vmem>>, vector<8x128xf32>
    %cst = arith.constant dense<0.000000e+00> : vector<8x128xf32>
    %6 = tpu.matmul %5, %0, %cst {dimension_numbers = #tpu.dot_dimension_numbers<[1], [0], [0], [1], [0, 0, 1, 1], [], []>} : vector<8x128xf32>, vector<128x128xf32>, vector<8x128xf32> -> vector<8x128xf32>
    %7 = vector.broadcast %3 : vector<1x128xf32> to vector<8x128xf32>
    %8 = arith.addf %6, %7 : vector<8x128xf32>
    %cst_5 = arith.constant 0.000000e+00 : f32
    %9 = vector.broadcast %cst_5 : f32 to vector<8x128xf32>
    %10 = arith.maximumf %8, %9 : vector<8x128xf32>
    %cst_6 = arith.constant dense<0.000000e+00> : vector<8x128xf32>
    %11 = tpu.matmul %10, %0, %cst_6 {dimension_numbers = #tpu.dot_dimension_numbers<[1], [0], [0], [1], [0, 0, 1, 1], [], []>} : vector<8x128xf32>, vector<128x128xf32>, vector<8x128xf32> -> vector<8x128xf32>
    %12 = vector.broadcast %4 : vector<1x128xf32> to vector<8x128xf32>
    %13 = arith.addf %11, %12 : vector<8x128xf32>
    %c0_7 = arith.constant 0 : index
    %c0_8 = arith.constant 0 : index
    %14 = vector.load %arg1[%c0_7, %c0_8] : memref<8x128xf32, #tpu.memory_space<vmem>>, vector<8x128xf32>
    %cst_9 = arith.constant 1.000000e+00 : f32
    %15 = vector.broadcast %cst_9 : f32 to vector<8x128xf32>
    %16 = arith.mulf %14, %15 : vector<8x128xf32>
    %cst_10 = arith.constant 0.89442718 : f32
    %17 = vector.broadcast %cst_10 : f32 to vector<8x128xf32>
    %18 = arith.mulf %17, %16 : vector<8x128xf32>
    %19 = arith.addf %13, %18 : vector<8x128xf32>
    %cst_11 = arith.constant dense<0.000000e+00> : vector<8x128xf32>
    %20 = tpu.matmul %19, %0, %cst_11 {dimension_numbers = #tpu.dot_dimension_numbers<[1], [0], [0], [1], [0, 0, 1, 1], [], []>} : vector<8x128xf32>, vector<128x128xf32>, vector<8x128xf32> -> vector<8x128xf32>
    %21 = vector.extract_strided_slice %1 {offsets = [2, 0], sizes = [1, 128], strides = [1, 1]} : vector<8x128xf32> to vector<1x128xf32>
    %22 = vector.broadcast %21 : vector<1x128xf32> to vector<8x128xf32>
    %23 = arith.addf %20, %22 : vector<8x128xf32>
    %cst_12 = arith.constant 0.000000e+00 : f32
    %24 = vector.broadcast %cst_12 : f32 to vector<8x128xf32>
    %25 = arith.maximumf %23, %24 : vector<8x128xf32>
    %cst_13 = arith.constant dense<0.000000e+00> : vector<8x128xf32>
    %26 = tpu.matmul %25, %0, %cst_13 {dimension_numbers = #tpu.dot_dimension_numbers<[1], [0], [0], [1], [0, 0, 1, 1], [], []>} : vector<8x128xf32>, vector<128x128xf32>, vector<8x128xf32> -> vector<8x128xf32>
    %cst_14 = arith.constant 0.602598548 : f32
    %27 = vector.broadcast %cst_14 : f32 to vector<8x128xf32>
    %28 = arith.mulf %27, %16 : vector<8x128xf32>
    %cst_15 = arith.constant 0.22215417 : f32
    %29 = vector.broadcast %cst_15 : f32 to vector<8x128xf32>
    %30 = arith.mulf %29, %26 : vector<8x128xf32>
    %31 = arith.addf %28, %30 : vector<8x128xf32>
    %32 = vector.extract_strided_slice %2 {offsets = [0, 0], sizes = [1, 128], strides = [1, 1]} : vector<8x128xf32> to vector<1x128xf32>
    %33 = vector.broadcast %32 : vector<1x128xf32> to vector<8x128xf32>
    %34 = arith.addf %31, %33 : vector<8x128xf32>
    %cst_16 = arith.constant 1.40962744 : f32
    %35 = vector.broadcast %cst_16 : f32 to vector<8x128xf32>
    %36 = arith.mulf %35, %34 : vector<8x128xf32>
    %37 = arith.addf %13, %36 : vector<8x128xf32>
    %cst_17 = arith.constant dense<0.000000e+00> : vector<8x128xf32>
    %38 = tpu.matmul %37, %0, %cst_17 {dimension_numbers = #tpu.dot_dimension_numbers<[1], [0], [0], [1], [0, 0, 1, 1], [], []>} : vector<8x128xf32>, vector<128x128xf32>, vector<8x128xf32> -> vector<8x128xf32>
    %39 = vector.extract_strided_slice %1 {offsets = [3, 0], sizes = [1, 128], strides = [1, 1]} : vector<8x128xf32> to vector<1x128xf32>
    %40 = vector.broadcast %39 : vector<1x128xf32> to vector<8x128xf32>
    %41 = arith.addf %38, %40 : vector<8x128xf32>
    %cst_18 = arith.constant 0.000000e+00 : f32
    %42 = vector.broadcast %cst_18 : f32 to vector<8x128xf32>
    %43 = arith.maximumf %41, %42 : vector<8x128xf32>
    %cst_19 = arith.constant dense<0.000000e+00> : vector<8x128xf32>
    %44 = tpu.matmul %43, %0, %cst_19 {dimension_numbers = #tpu.dot_dimension_numbers<[1], [0], [0], [1], [0, 0, 1, 1], [], []>} : vector<8x128xf32>, vector<128x128xf32>, vector<8x128xf32> -> vector<8x128xf32>
    %cst_20 = arith.constant 7.317730e-01 : f32
    %45 = vector.broadcast %cst_20 : f32 to vector<8x128xf32>
    %46 = arith.mulf %45, %34 : vector<8x128xf32>
    %cst_21 = arith.constant 0.189054012 : f32
    %47 = vector.broadcast %cst_21 : f32 to vector<8x128xf32>
    %48 = arith.mulf %47, %44 : vector<8x128xf32>
    %49 = arith.addf %46, %48 : vector<8x128xf32>
    %50 = vector.extract_strided_slice %2 {offsets = [1, 0], sizes = [1, 128], strides = [1, 1]} : vector<8x128xf32> to vector<1x128xf32>
    %51 = vector.broadcast %50 : vector<1x128xf32> to vector<8x128xf32>
    %52 = arith.addf %49, %51 : vector<8x128xf32>
    %cst_22 = arith.constant 1.81002569 : f32
    %53 = vector.broadcast %cst_22 : f32 to vector<8x128xf32>
    %54 = arith.mulf %53, %52 : vector<8x128xf32>
    %55 = arith.addf %13, %54 : vector<8x128xf32>
    %cst_23 = arith.constant dense<0.000000e+00> : vector<8x128xf32>
    %56 = tpu.matmul %55, %0, %cst_23 {dimension_numbers = #tpu.dot_dimension_numbers<[1], [0], [0], [1], [0, 0, 1, 1], [], []>} : vector<8x128xf32>, vector<128x128xf32>, vector<8x128xf32> -> vector<8x128xf32>
    %57 = vector.extract_strided_slice %1 {offsets = [4, 0], sizes = [1, 128], strides = [1, 1]} : vector<8x128xf32> to vector<1x128xf32>
    %58 = vector.broadcast %57 : vector<1x128xf32> to vector<8x128xf32>
    %59 = arith.addf %56, %58 : vector<8x128xf32>
    %cst_24 = arith.constant 0.000000e+00 : f32
    %60 = vector.broadcast %cst_24 : f32 to vector<8x128xf32>
    %61 = arith.maximumf %59, %60 : vector<8x128xf32>
    %cst_25 = arith.constant dense<0.000000e+00> : vector<8x128xf32>
    %62 = tpu.matmul %61, %0, %cst_25 {dimension_numbers = #tpu.dot_dimension_numbers<[1], [0], [0], [1], [0, 0, 1, 1], [], []>} : vector<8x128xf32>, vector<128x128xf32>, vector<8x128xf32> -> vector<8x128xf32>
    %cst_26 = arith.constant 0.896043896 : f32
    %63 = vector.broadcast %cst_26 : f32 to vector<8x128xf32>
    %64 = arith.mulf %63, %52 : vector<8x128xf32>
    %cst_27 = arith.constant 0.122190833 : f32
    %65 = vector.broadcast %cst_27 : f32 to vector<8x128xf32>
    %66 = arith.mulf %65, %62 : vector<8x128xf32>
    %67 = arith.addf %64, %66 : vector<8x128xf32>
    %68 = vector.extract_strided_slice %2 {offsets = [2, 0], sizes = [1, 128], strides = [1, 1]} : vector<8x128xf32> to vector<1x128xf32>
    %69 = vector.broadcast %68 : vector<1x128xf32> to vector<8x128xf32>
    %70 = arith.addf %67, %69 : vector<8x128xf32>
    %cst_28 = arith.constant 1.96116138 : f32
    %71 = vector.broadcast %cst_28 : f32 to vector<8x128xf32>
    %72 = arith.mulf %71, %70 : vector<8x128xf32>
    %73 = arith.addf %13, %72 : vector<8x128xf32>
    %cst_29 = arith.constant dense<0.000000e+00> : vector<8x128xf32>
    %74 = tpu.matmul %73, %0, %cst_29 {dimension_numbers = #tpu.dot_dimension_numbers<[1], [0], [0], [1], [0, 0, 1, 1], [], []>} : vector<8x128xf32>, vector<128x128xf32>, vector<8x128xf32> -> vector<8x128xf32>
    %75 = vector.extract_strided_slice %1 {offsets = [5, 0], sizes = [1, 128], strides = [1, 1]} : vector<8x128xf32> to vector<1x128xf32>
    %76 = vector.broadcast %75 : vector<1x128xf32> to vector<8x128xf32>
    %77 = arith.addf %74, %76 : vector<8x128xf32>
    %cst_30 = arith.constant 0.000000e+00 : f32
    %78 = vector.broadcast %cst_30 : f32 to vector<8x128xf32>
    %79 = arith.maximumf %77, %78 : vector<8x128xf32>
    %cst_31 = arith.constant dense<0.000000e+00> : vector<8x128xf32>
    %80 = tpu.matmul %79, %0, %cst_31 {dimension_numbers = #tpu.dot_dimension_numbers<[1], [0], [0], [1], [0, 0, 1, 1], [], []>} : vector<8x128xf32>, vector<128x128xf32>, vector<8x128xf32> -> vector<8x128xf32>
    %cst_32 = arith.constant 0.961538434 : f32
    %81 = vector.broadcast %cst_32 : f32 to vector<8x128xf32>
    %82 = arith.mulf %81, %70 : vector<8x128xf32>
    %cst_33 = arith.constant 0.0980580672 : f32
    %83 = vector.broadcast %cst_33 : f32 to vector<8x128xf32>
    %84 = arith.mulf %83, %80 : vector<8x128xf32>
    %85 = arith.addf %82, %84 : vector<8x128xf32>
    %86 = vector.extract_strided_slice %2 {offsets = [3, 0], sizes = [1, 128], strides = [1, 1]} : vector<8x128xf32> to vector<1x128xf32>
    %87 = vector.broadcast %86 : vector<1x128xf32> to vector<8x128xf32>
    %88 = arith.addf %85, %87 : vector<8x128xf32>
    %cst_34 = arith.constant -1.000000e+00 : f32
    %cst_35 = arith.constant 1.000000e+00 : f32
    %89 = vector.broadcast %cst_34 : f32 to vector<8x128xf32>
    %90 = arith.maximumf %89, %88 : vector<8x128xf32>
    %91 = vector.broadcast %cst_35 : f32 to vector<8x128xf32>
    %92 = arith.minimumf %91, %90 : vector<8x128xf32>
    %c0_36 = arith.constant 0 : index
    %c0_37 = arith.constant 0 : index
    %93 = vector.load %arg3[%c0_36, %c0_37] : memref<8x128xf32, #tpu.memory_space<vmem>>, vector<8x128xf32>
    tpu.vector_store %arg3[%c0_36, %c0_37], %92 {strides = array<i32>} : memref<8x128xf32, #tpu.memory_space<vmem>>, vector<8x128xf32>,
    return
  }
}

</mosaic_0001>

<bundles_post_ra>
// kernel: beso_forward.1
= control target key start
LH: loop header
LB: loop body
LE: loop exit
PB: predicated region body
PF: predicated region fallthrough
CT: control target
= control target key end

     0   :  { %8 = vsyncpa [#allocation3], 0  ;;  %s1616_s12 = smov [#allocation2]   ;;  %s1903_s0 = inlined_call_operand.vmem [shape: f32[8,128], index: 0, kind: input, shape index: {}]   ;;  %s1904_s1 = inlined_call_operand.vmem [shape: f32[8,128], index: 1, kind: input, shape index: {}]   ;;  %s1905_s2 = inlined_call_operand.hbm [shape: f32[144,128], index: 2, kind: input, shape index: {}]   ;;  %s1906_s3 = inlined_call_operand.vmem [shape: f32[8,128], index: 3, kind: output, shape index: {}]  }
   0x1   :  { %s18_s13 = sshll.u32 %s1616_s12, 4  ;;  %s1592_s16 = scalar_lea.hbm %s1905_s2, 2304  ;;  %s19_s13 = int_to_ptr.vmem [resolvable:$true] %s18_s13 }
   0x2   :  { %p1593_p0 = scmp.ne.s32.totalorder %s1905_s2, %s1592_s16  ;;  %p1596_p1 = scmp.lt.u32.totalorder %s1592_s16, %s1905_s2 }
   0x4   :  { %p1598_p2 = pnand %p1596_p1, %p1593_p0 }
   0x6   :  { %1601 = shalt.err (!%p1598_p2)
}
   0x7   :  { %s1602_s21 = scalar_lea.vmem %s19_s13, 2304  ;;  %p1607_p4 = scmp.lt.s32.totalorder %s19_s13, %s19_s13 }
   0x8   :  { %p1603_p3 = scmp.ne.s32.totalorder %s19_s13, %s1602_s21  ;;  %p1608_p5 = scmp.lt.s32.totalorder %s1602_s21, %s1602_s21 }
   0xa   :  { %p1609_p6 = por %p1608_p5, %p1607_p4 }
   0xc   :  { %p1610_p7 = pnand %p1609_p6, %p1603_p3 }
   0xe   :  { %1613 = shalt.err (!%p1610_p7)
}
   0xf   :  { %s1617_s22 = smov 128   ;;  %s1618_s23 = smov 8  }
  0x10   :  { %24 = dma.hbm_to_vmem [thread:$0]  %s1905_s2, 2304, %s19_s13, [#allocation3], %s1617_s22, %s1617_s22, %s1618_s23  }
  0x11   :  { %1614 = dma.done.wait [#allocation3], 2304  }
  0x12   :  { %1615 = vsyncadd [#allocation3], 4294964992  ;;  %v1619_v0 = vmov 0.0|0.0   ;;  %vm1620_vm0 = vmmov 0   ;;  %v1621_v1 = vmov 0.0   ;;  %v28_v2 = vld [vmem:[#allocation2] sm:$0xff]  ;;  %v47_v27 = vlaneseq }
  0x13   :  { %1346 = vmatprep.subr.bf16.mxu0 %v1619_v0  ;;  %1028 = vmatprep.mubr.msk.f32.mxu0 %vm1620_vm0, %v1621_v1  ;;  %v29_v3 = vld [vmem:[#allocation2 + $0x8] sm:$0xff]  ;;  %v30_v4 = vld [vmem:[#allocation2 + $0x10] sm:$0xff]  ;;  %v31_v6 = vld [vmem:[#allocation2 + $0x18] sm:$0xff] }
  0x14   :  { %1370 = vmatprep.subr.bf16.mxu1 %v1619_v0  ;;  %1063 = vmatprep.mubr.msk.f32.mxu1 %vm1620_vm0, %v1621_v1  ;;  %v1660_v5 = vpack.c.bf16 %v29_v3, %v28_v2  ;;  %v1663_v7 = vpack.c.bf16 %v31_v6, %v30_v4  ;;  %v32_v8 = vld [vmem:[#allocation2 + $0x20] sm:$0xff]  ;;  %v33_v9 = vld [vmem:[#allocation2 + $0x28] sm:$0xff]  ;;  %v34_v11 = vld [vmem:[#allocation2 + $0x30] sm:$0xff]  ;;  %v1729_v28 = vshrl.u32 %v47_v27, 7 }
  0x15   :  { %v1669_v10 = vpack.c.bf16 %v33_v9, %v32_v8  ;;  %v35_v12 = vld [vmem:[#allocation2 + $0x38] sm:$0xff]  ;;  %v36_v14 = vld [vmem:[#allocation2 + $0x40] sm:$0xff]  ;;  %v37_v15 = vld [vmem:[#allocation2 + $0x48] sm:$0xff] }
  0x16   :  { %1348 = vmatpush3.bf16.msra.mxu0 %v1660_v5  ;;  %1372 = vmatpush3.bf16.msra.mxu1 %v1660_v5  ;;  %v1675_v13 = vpack.c.bf16 %v35_v12, %v34_v11  ;;  %v1681_v16 = vpack.c.bf16 %v37_v15, %v36_v14  ;;  %v38_v17 = vld [vmem:[#allocation2 + $0x50] sm:$0xff]  ;;  %v39_v18 = vld [vmem:[#allocation2 + $0x58] sm:$0xff]  ;;  %v40_v20 = vld [vmem:[#allocation2 + $0x60] sm:$0xff]  ;;  %v49_v29 = vsub.s32 0, %v1729_v28  ;;  %v124_v36 = vsub.s32 1, %v1729_v28 }
  0x17   :  { %1349 = vmatprep.subr.bf16.mxu0 %v1619_v0  ;;  %1373 = vmatprep.subr.bf16.mxu1 %v1619_v0  ;;  %v1687_v19 = vpack.c.bf16 %v39_v18, %v38_v17  ;;  %v41_v21 = vld [vmem:[#allocation2 + $0x68] sm:$0xff]  ;;  %v42_v23 = vld [vmem:[#allocation2 + $0x70] sm:$0xff]  ;;  %v43_v24 = vld [vmem:[#allocation2 + $0x78] sm:$0xff]  ;;  %v201_v44 = vsub.s32 2, %v1729_v28  ;;  %v356_v60 = vsub.s32 3, %v1729_v28  ;;  %v511_v18 = vsub.s32 4, %v1729_v28 }
  0x18   :  { %v1693_v22 = vpack.c.bf16 %v41_v21, %v40_v20  ;;  %v1699_v25 = vpack.c.bf16 %v43_v24, %v42_v23  ;;  %v46_v26 = vld [vmem:[%s1903_s0] sm:$0xff]  ;;  %v1805_v50 = vld [vmem:[#allocation2 + $0x88] sm:$0xff] }
  0x19   :  { %v1732_v30 = vld [vmem:[#allocation2 + $0x80] sm:$0xff]  ;;  %v350_v54 = vrot.slane %v1805_v50, %v49_v29  ;;  %v505_v9 = vrot.slane %v1805_v50, %v124_v36 }
  0x1a   :  { %1351 = vmatpush3.bf16.msra.mxu0 %v1663_v7  ;;  %1375 = vmatpush3.bf16.msra.mxu1 %v1663_v7  ;;  %v50_v31 = vrot.slane %v1732_v30, %v49_v29  ;;  %v196_v37 = vld [vmem:[%s1904_s1] sm:$0xff]  ;;  %v125_v38 = vrot.slane %v1732_v30, %v124_v36  ;;  %v202_v45 = vrot.slane %v1732_v30, %v201_v44 }
  0x1b   :  { %1352 = vmatprep.subr.bf16.mxu0 %v1619_v0  ;;  %1376 = vmatprep.subr.bf16.mxu1 %v1619_v0  ;;  %v197_v39 = vmul.f32 0.8944272, %v196_v37  ;;  %v344_v51 = vmul.f32 0.60259855, %v196_v37  ;;  %v357_v61 = vrot.slane %v1732_v30, %v356_v60  ;;  %v512_v20 = vrot.slane %v1732_v30, %v511_v18 }
  0x1c   :  { %v815_v37 = vrot.slane %v1805_v50, %v356_v60 }
  0x1e   :  { %1354 = vmatpush3.bf16.msra.mxu0 %v1669_v10  ;;  %1378 = vmatpush3.bf16.msra.mxu1 %v1669_v10 }
  0x1f   :  { %1355 = vmatprep.subr.bf16.mxu0 %v1619_v0  ;;  %1379 = vmatprep.subr.bf16.mxu1 %v1619_v0 }
  0x22   :  { %1357 = vmatpush3.bf16.msra.mxu0 %v1675_v13  ;;  %1381 = vmatpush3.bf16.msra.mxu1 %v1675_v13 }
  0x23   :  { %1358 = vmatprep.subr.bf16.mxu0 %v1619_v0  ;;  %1382 = vmatprep.subr.bf16.mxu1 %v1619_v0 }
  0x26   :  { %1360 = vmatpush3.bf16.msra.mxu0 %v1681_v16  ;;  %1384 = vmatpush3.bf16.msra.mxu1 %v1681_v16 }
  0x27   :  { %1361 = vmatprep.subr.bf16.mxu0 %v1619_v0  ;;  %1385 = vmatprep.subr.bf16.mxu1 %v1619_v0 }
  0x2a   :  { %1363 = vmatpush3.bf16.msra.mxu0 %v1687_v19  ;;  %1387 = vmatpush3.bf16.msra.mxu1 %v1687_v19 }
  0x2b   :  { %1364 = vmatprep.subr.bf16.mxu0 %v1619_v0  ;;  %1388 = vmatprep.subr.bf16.mxu1 %v1619_v0 }
  0x2e   :  { %1366 = vmatpush3.bf16.msra.mxu0 %v1693_v22  ;;  %1390 = vmatpush3.bf16.msra.mxu1 %v1693_v22 }
  0x2f   :  { %1367 = vmatprep.subr.bf16.mxu0 %v1619_v0  ;;  %1391 = vmatprep.subr.bf16.mxu1 %v1619_v0 }
  0x32   :  { %1369 = vmatpush3.bf16.msra.mxu0 %v1699_v25  ;;  %1393 = vmatpush3.bf16.msra.mxu1 %v1699_v25 }
  0x33   :  { %1394 = vmatprep.subr.bf16.mxu0 %v1619_v0  ;;  %1418 = vmatprep.subr.bf16.mxu1 %v1619_v0 }
  0x35   :  { %1029 = vmatmul.mubr.f32.vlgmr.msra.gmra.mrb[0].mxu0 %v46_v26 }
  0x36   :  { %1396 = vmatpush3.bf16.msra.mxu0 %v1660_v5  ;;  %1098 = vmatprep.mubr.msk.f32.mxu0 %vm1620_vm0, %v1621_v1 }
  0x37   :  { %1397 = vmatprep.subr.bf16.mxu0 %v1619_v0 }
  0x3a   :  { %1399 = vmatpush3.bf16.msra.mxu0 %v1663_v7 }
  0x3b   :  { %1400 = vmatprep.subr.bf16.mxu0 %v1619_v0 }
  0x3e   :  { %1402 = vmatpush3.bf16.msra.mxu0 %v1669_v10 }
  0x3f   :  { %1403 = vmatprep.subr.bf16.mxu0 %v1619_v0 }
  0x42   :  { %1405 = vmatpush3.bf16.msra.mxu0 %v1675_v13 }
  0x43   :  { %1406 = vmatprep.subr.bf16.mxu0 %v1619_v0 }
  0x46   :  { %1408 = vmatpush3.bf16.msra.mxu0 %v1681_v16 }
  0x47   :  { %1409 = vmatprep.subr.bf16.mxu0 %v1619_v0 }
  0x4a   :  { %1411 = vmatpush3.bf16.msra.mxu0 %v1687_v19 }
  0x4b   :  { %1412 = vmatprep.subr.bf16.mxu0 %v1619_v0 }
  0x4e   :  { %1414 = vmatpush3.bf16.msra.mxu0 %v1693_v22 }
  0x4f   :  { %1415 = vmatprep.subr.bf16.mxu0 %v1619_v0 }
  0x52   :  { %1417 = vmatpush3.bf16.msra.mxu0 %v1699_v25 }
  0x53   :  { %1442 = vmatprep.subr.bf16.mxu0 %v1619_v0 }
 0x108   :  { %v117_v32 = vpop.f32.mrb[0].mxu0 }
 0x109   :  { %v118_v33 = vadd.f32 %v117_v32, %v50_v31  ;;  %v1030_v34 = vpop.f32.mrb[1].mxu0 }
 0x10b   :  { %v121_v35 = vmax.f32 %v118_v33, 0.0 }
 0x10d   :  { %1064 = vmatmul.mubr.f32.vlgmr.msra.gmra.mrb[0].mxu1 %v121_v35 }
 0x10e   :  { %1420 = vmatpush3.bf16.msra.mxu1 %v1660_v5  ;;  %1133 = vmatprep.mubr.msk.f32.mxu1 %vm1620_vm0, %v1621_v1 }
 0x10f   :  { %1421 = vmatprep.subr.bf16.mxu1 %v1619_v0 }
 0x112   :  { %1423 = vmatpush3.bf16.msra.mxu1 %v1663_v7 }
 0x113   :  { %1424 = vmatprep.subr.bf16.mxu1 %v1619_v0 }
 0x116   :  { %1426 = vmatpush3.bf16.msra.mxu1 %v1669_v10 }
 0x117   :  { %1427 = vmatprep.subr.bf16.mxu1 %v1619_v0 }
 0x11a   :  { %1429 = vmatpush3.bf16.msra.mxu1 %v1675_v13 }
 0x11b   :  { %1430 = vmatprep.subr.bf16.mxu1 %v1619_v0 }
 0x11e   :  { %1432 = vmatpush3.bf16.msra.mxu1 %v1681_v16 }
 0x11f   :  { %1433 = vmatprep.subr.bf16.mxu1 %v1619_v0 }
 0x122   :  { %1435 = vmatpush3.bf16.msra.mxu1 %v1687_v19 }
 0x123   :  { %1436 = vmatprep.subr.bf16.mxu1 %v1619_v0 }
 0x126   :  { %1438 = vmatpush3.bf16.msra.mxu1 %v1693_v22 }
 0x127   :  { %1439 = vmatprep.subr.bf16.mxu1 %v1619_v0 }
 0x12a   :  { %1441 = vmatpush3.bf16.msra.mxu1 %v1699_v25 }
 0x12b   :  { %1466 = vmatprep.subr.bf16.mxu1 %v1619_v0 }
 0x1e0   :  { %v192_v40 = vpop.f32.mrb[0].mxu1 }
 0x1e1   :  { %v1762_v41 = vadd.f32 %v192_v40, %v125_v38  ;;  %v1065_v42 = vpop.f32.mrb[1].mxu1 }
 0x1e3   :  { %v198_v43 = vadd.f32 %v197_v39, %v1762_v41 }
 0x1e5   :  { %1099 = vmatmul.mubr.f32.vlgmr.msra.gmra.mrb[2].mxu0 %v198_v43 }
 0x1e6   :  { %1444 = vmatpush3.bf16.msra.mxu0 %v1660_v5  ;;  %1168 = vmatprep.mubr.msk.f32.mxu0 %vm1620_vm0, %v1621_v1 }
 0x1e7   :  { %1445 = vmatprep.subr.bf16.mxu0 %v1619_v0 }
 0x1ea   :  { %1447 = vmatpush3.bf16.msra.mxu0 %v1663_v7 }
 0x1eb   :  { %1448 = vmatprep.subr.bf16.mxu0 %v1619_v0 }
 0x1ee   :  { %1450 = vmatpush3.bf16.msra.mxu0 %v1669_v10 }
 0x1ef   :  { %1451 = vmatprep.subr.bf16.mxu0 %v1619_v0 }
 0x1f2   :  { %1453 = vmatpush3.bf16.msra.mxu0 %v1675_v13 }
 0x1f3   :  { %1454 = vmatprep.subr.bf16.mxu0 %v1619_v0 }
 0x1f6   :  { %1456 = vmatpush3.bf16.msra.mxu0 %v1681_v16 }
 0x1f7   :  { %1457 = vmatprep.subr.bf16.mxu0 %v1619_v0 }
 0x1fa   :  { %1459 = vmatpush3.bf16.msra.mxu0 %v1687_v19 }
 0x1fb   :  { %1460 = vmatprep.subr.bf16.mxu0 %v1619_v0 }
 0x1fe   :  { %1462 = vmatpush3.bf16.msra.mxu0 %v1693_v22 }
 0x1ff   :  { %1463 = vmatprep.subr.bf16.mxu0 %v1619_v0 }
 0x202   :  { %1465 = vmatpush3.bf16.msra.mxu0 %v1699_v25 }
 0x203   :  { %1490 = vmatprep.subr.bf16.mxu0 %v1619_v0 }
 0x2b8   :  { %v269_v46 = vpop.f32.mrb[2].mxu0 }
 0x2b9   :  { %v270_v47 = vadd.f32 %v269_v46, %v202_v45  ;;  %v1100_v48 = vpop.f32.mrb[3].mxu0 }
 0x2bb   :  { %v273_v49 = vmax.f32 %v270_v47, 0.0 }
 0x2bd   :  { %1134 = vmatmul.mubr.f32.vlgmr.msra.gmra.mrb[2].mxu1 %v273_v49 }
 0x2be   :  { %1468 = vmatpush3.bf16.msra.mxu1 %v1660_v5  ;;  %1203 = vmatprep.mubr.msk.f32.mxu1 %vm1620_vm0, %v1621_v1 }
 0x2bf   :  { %1469 = vmatprep.subr.bf16.mxu1 %v1619_v0 }
 0x2c2   :  { %1471 = vmatpush3.bf16.msra.mxu1 %v1663_v7 }
 0x2c3   :  { %1472 = vmatprep.subr.bf16.mxu1 %v1619_v0 }
 0x2c6   :  { %1474 = vmatpush3.bf16.msra.mxu1 %v1669_v10 }
 0x2c7   :  { %1475 = vmatprep.subr.bf16.mxu1 %v1619_v0 }
 0x2ca   :  { %1477 = vmatpush3.bf16.msra.mxu1 %v1675_v13 }
 0x2cb   :  { %1478 = vmatprep.subr.bf16.mxu1 %v1619_v0 }
 0x2ce   :  { %1480 = vmatpush3.bf16.msra.mxu1 %v1681_v16 }
 0x2cf   :  { %1481 = vmatprep.subr.bf16.mxu1 %v1619_v0 }
 0x2d2   :  { %1483 = vmatpush3.bf16.msra.mxu1 %v1687_v19 }
 0x2d3   :  { %1484 = vmatprep.subr.bf16.mxu1 %v1619_v0 }
 0x2d6   :  { %1486 = vmatpush3.bf16.msra.mxu1 %v1693_v22 }
 0x2d7   :  { %1487 = vmatprep.subr.bf16.mxu1 %v1619_v0 }
 0x2da   :  { %1489 = vmatpush3.bf16.msra.mxu1 %v1699_v25 }
 0x2db   :  { %1514 = vmatprep.subr.bf16.mxu1 %v1619_v0 }
 0x390   :  { %v340_v52 = vpop.f32.mrb[2].mxu1 }
 0x391   :  { %v345_v53 = vmul.f32 0.22215417, %v340_v52  ;;  %v1135_v55 = vpop.f32.mrb[3].mxu1 }
 0x393   :  { %v346_v56 = vadd.f32 %v345_v53, %v344_v51 }
 0x395   :  { %v351_v57 = vadd.f32 %v350_v54, %v346_v56 }
 0x397   :  { %v352_v58 = vmul.f32 1.4096274, %v351_v57  ;;  %v499_v6 = vmul.f32 0.731773, %v351_v57 }
 0x399   :  { %v353_v59 = vadd.f32 %v352_v58, %v1762_v41 }
 0x39b   :  { %1169 = vmatmul.mubr.f32.vlgmr.msra.gmra.mrb[4].mxu0 %v353_v59 }
 0x39c   :  { %1492 = vmatpush3.bf16.msra.mxu0 %v1660_v5  ;;  %1238 = vmatprep.mubr.msk.f32.mxu0 %vm1620_vm0, %v1621_v1 }
 0x39d   :  { %1493 = vmatprep.subr.bf16.mxu0 %v1619_v0 }
 0x3a0   :  { %1495 = vmatpush3.bf16.msra.mxu0 %v1663_v7 }
 0x3a1   :  { %1496 = vmatprep.subr.bf16.mxu0 %v1619_v0 }
 0x3a4   :  { %1498 = vmatpush3.bf16.msra.mxu0 %v1669_v10 }
 0x3a5   :  { %1499 = vmatprep.subr.bf16.mxu0 %v1619_v0 }
 0x3a8   :  { %1501 = vmatpush3.bf16.msra.mxu0 %v1675_v13 }
 0x3a9   :  { %1502 = vmatprep.subr.bf16.mxu0 %v1619_v0 }
 0x3ac   :  { %1504 = vmatpush3.bf16.msra.mxu0 %v1681_v16 }
 0x3ad   :  { %1505 = vmatprep.subr.bf16.mxu0 %v1619_v0 }
 0x3b0   :  { %1507 = vmatpush3.bf16.msra.mxu0 %v1687_v19 }
 0x3b1   :  { %1508 = vmatprep.subr.bf16.mxu0 %v1619_v0 }
 0x3b4   :  { %1510 = vmatpush3.bf16.msra.mxu0 %v1693_v22 }
 0x3b5   :  { %1511 = vmatprep.subr.bf16.mxu0 %v1619_v0 }
 0x3b8   :  { %1513 = vmatpush3.bf16.msra.mxu0 %v1699_v25 }
 0x3b9   :  { %1538 = vmatprep.subr.bf16.mxu0 %v1619_v0 }
 0x46e   :  { %v424_v62 = vpop.f32.mrb[4].mxu0 }
 0x46f   :  { %v425_v63 = vadd.f32 %v424_v62, %v357_v61  ;;  %v1170_v2 = vpop.f32.mrb[5].mxu0 }
 0x471   :  { %v428_v3 = vmax.f32 %v425_v63, 0.0 }
 0x473   :  { %1204 = vmatmul.mubr.f32.vlgmr.msra.gmra.mrb[4].mxu1 %v428_v3 }
 0x474   :  { %1516 = vmatpush3.bf16.msra.mxu1 %v1660_v5  ;;  %1273 = vmatprep.mubr.msk.f32.mxu1 %vm1620_vm0, %v1621_v1 }
 0x475   :  { %1517 = vmatprep.subr.bf16.mxu1 %v1619_v0 }
 0x478   :  { %1519 = vmatpush3.bf16.msra.mxu1 %v1663_v7 }
 0x479   :  { %1520 = vmatprep.subr.bf16.mxu1 %v1619_v0 }
 0x47c   :  { %1522 = vmatpush3.bf16.msra.mxu1 %v1669_v10 }
 0x47d   :  { %1523 = vmatprep.subr.bf16.mxu1 %v1619_v0 }
 0x480   :  { %1525 = vmatpush3.bf16.msra.mxu1 %v1675_v13 }
 0x481   :  { %1526 = vmatprep.subr.bf16.mxu1 %v1619_v0 }
 0x484   :  { %1528 = vmatpush3.bf16.msra.mxu1 %v1681_v16 }
 0x485   :  { %1529 = vmatprep.subr.bf16.mxu1 %v1619_v0 }
 0x488   :  { %1531 = vmatpush3.bf16.msra.mxu1 %v1687_v19 }
 0x489   :  { %1532 = vmatprep.subr.bf16.mxu1 %v1619_v0 }
 0x48c   :  { %1534 = vmatpush3.bf16.msra.mxu1 %v1693_v22 }
 0x48d   :  { %1535 = vmatprep.subr.bf16.mxu1 %v1619_v0 }
 0x490   :  { %1537 = vmatpush3.bf16.msra.mxu1 %v1699_v25 }
 0x491   :  { %1562 = vmatprep.subr.bf16.mxu1 %v1619_v0 }
 0x546   :  { %v495_v4 = vpop.f32.mrb[4].mxu1 }
 0x547   :  { %v500_v8 = vmul.f32 0.18905401, %v495_v4  ;;  %v1205_v11 = vpop.f32.mrb[5].mxu1 }
 0x549   :  { %v501_v12 = vadd.f32 %v500_v8, %v499_v6 }
 0x54b   :  { %v506_v14 = vadd.f32 %v505_v9, %v501_v12 }
 0x54d   :  { %v507_v15 = vmul.f32 1.8100257, %v506_v14 }
 0x54f   :  { %v508_v17 = vadd.f32 %v507_v15, %v1762_v41 }
 0x551   :  { %1239 = vmatmul.mubr.f32.vlgmr.msra.gmra.mrb[6].mxu0 %v508_v17 }
 0x552   :  { %1540 = vmatpush3.bf16.msra.mxu0 %v1660_v5  ;;  %1308 = vmatprep.mubr.msk.f32.mxu0 %vm1620_vm0, %v1621_v1 }
 0x553   :  { %1541 = vmatprep.subr.bf16.mxu0 %v1619_v0 }
 0x556   :  { %1543 = vmatpush3.bf16.msra.mxu0 %v1663_v7 }
 0x557   :  { %1544 = vmatprep.subr.bf16.mxu0 %v1619_v0 }
 0x55a   :  { %1546 = vmatpush3.bf16.msra.mxu0 %v1669_v10 }
 0x55b   :  { %1547 = vmatprep.subr.bf16.mxu0 %v1619_v0 }
 0x55e   :  { %1549 = vmatpush3.bf16.msra.mxu0 %v1675_v13 }
 0x55f   :  { %1550 = vmatprep.subr.bf16.mxu0 %v1619_v0 }
 0x562   :  { %1552 = vmatpush3.bf16.msra.mxu0 %v1681_v16 }
 0x563   :  { %1553 = vmatprep.subr.bf16.mxu0 %v1619_v0 }
 0x566   :  { %1555 = vmatpush3.bf16.msra.mxu0 %v1687_v19 }
 0x567   :  { %1556 = vmatprep.subr.bf16.mxu0 %v1619_v0 }
 0x56a   :  { %1558 = vmatpush3.bf16.msra.mxu0 %v1693_v22 }
 0x56b   :  { %1559 = vmatprep.subr.bf16.mxu0 %v1619_v0 }
 0x56e   :  { %1561 = vmatpush3.bf16.msra.mxu0 %v1699_v25 }
 0x624   :  { %v579_v21 = vpop.f32.mrb[6].mxu0 }
 0x625   :  { %v580_v23 = vadd.f32 %v579_v21, %v512_v20  ;;  %v1240_v24 = vpop.f32.mrb[7].mxu0 }
 0x627   :  { %v583_v26 = vmax.f32 %v580_v23, 0.0 }
 0x629   :  { %1274 = vmatmul.mubr.f32.vlgmr.msra.gmra.mrb[6].mxu1 %v583_v26 }
 0x62a   :  { %1564 = vmatpush3.bf16.msra.mxu1 %v1660_v5  ;;  %1343 = vmatprep.mubr.msk.f32.mxu1 %vm1620_vm0, %v1621_v1  ;;  %v654_v5 = vmul.f32 0.8960439, %v506_v14 }
 0x62b   :  { %1565 = vmatprep.subr.bf16.mxu1 %v1619_v0 }
 0x62e   :  { %1567 = vmatpush3.bf16.msra.mxu1 %v1663_v7 }
 0x62f   :  { %1568 = vmatprep.subr.bf16.mxu1 %v1619_v0 }
 0x632   :  { %1570 = vmatpush3.bf16.msra.mxu1 %v1669_v10  ;;  %v660_v10 = vrot.slane %v1805_v50, %v201_v44 }
 0x633   :  { %1571 = vmatprep.subr.bf16.mxu1 %v1619_v0 }
 0x636   :  { %1573 = vmatpush3.bf16.msra.mxu1 %v1675_v13 }
 0x637   :  { %1574 = vmatprep.subr.bf16.mxu1 %v1619_v0 }
 0x63a   :  { %1576 = vmatpush3.bf16.msra.mxu1 %v1681_v16 }
 0x63b   :  { %1577 = vmatprep.subr.bf16.mxu1 %v1619_v0 }
 0x63e   :  { %1579 = vmatpush3.bf16.msra.mxu1 %v1687_v19 }
 0x63f   :  { %1580 = vmatprep.subr.bf16.mxu1 %v1619_v0 }
 0x642   :  { %1582 = vmatpush3.bf16.msra.mxu1 %v1693_v22  ;;  %v666_v22 = vsub.s32 5, %v1729_v28 }
 0x643   :  { %1583 = vmatprep.subr.bf16.mxu1 %v1619_v0 }
 0x644   :  { %v667_v0 = vrot.slane %v1732_v30, %v666_v22 }
 0x646   :  { %1585 = vmatpush3.bf16.msra.mxu1 %v1699_v25 }
 0x6fc   :  { %v650_v1 = vpop.f32.mrb[6].mxu1 }
 0x6fd   :  { %v655_v7 = vmul.f32 0.12219083, %v650_v1  ;;  %v1275_v13 = vpop.f32.mrb[7].mxu1 }
 0x6ff   :  { %v656_v16 = vadd.f32 %v655_v7, %v654_v5 }
 0x701   :  { %v661_v27 = vadd.f32 %v660_v10, %v656_v16 }
 0x703   :  { %v662_v29 = vmul.f32 1.9611614, %v661_v27  ;;  %v809_v35 = vmul.f32 0.96153843, %v661_v27 }
 0x705   :  { %v663_v19 = vadd.f32 %v662_v29, %v1762_v41 }
 0x707   :  { %1309 = vmatmul.mubr.f32.vlgmr.msra.gmra.mrb[8].mxu0 %v663_v19 }
 0x7da   :  { %v734_v31 = vpop.f32.mrb[8].mxu0 }
 0x7db   :  { %v735_v25 = vadd.f32 %v734_v31, %v667_v0  ;;  %v1310_v32 = vpop.f32.mrb[9].mxu0 }
 0x7dd   :  { %v738_v33 = vmax.f32 %v735_v25, 0.0 }
 0x7df   :  { %1344 = vmatmul.mubr.f32.vlgmr.msra.gmra.mrb[8].mxu1 %v738_v33 }
 0x8b2   :  { %v805_v34 = vpop.f32.mrb[8].mxu1 }
 0x8b3   :  { %v810_v36 = vmul.f32 0.09805807, %v805_v34  ;;  %v1345_v38 = vpop.f32.mrb[9].mxu1 }
 0x8b5   :  { %v811_v39 = vadd.f32 %v810_v36, %v809_v35 }
 0x8b7   :  { %v816_v40 = vadd.f32 %v815_v37, %v811_v39 }
 0x8b9   :  { %v825_v41 = vclamps-f32 %v816_v40, 1.0 }
 0x8bb   :  { %819 = vst [vmem:[%s1906_s3] sm:$0xff] %v825_v41 }
 0x8bc   :  { %824 = vsyncpa [#allocation3], 1 }

</bundles_post_ra>
